<compile_context>
chip_gen: v5e
topology: v5e:2x2
jax: 0.10.0
libtpu: 0.0.40
codegen_flags: <defaults>
</compile_context>

<pallas_src>
import math
import functools

import jax
import jax.numpy as jnp
from jax import lax
from jax.experimental import pallas as pl
from jax.experimental.pallas import tpu as pltpu

EPS = 1e-5  # nn.LayerNorm default
_INV_SQRT2 = 1.0 / math.sqrt(2.0)


def _layernorm_onepass(h, gamma, beta):
    """LayerNorm with single-pass statistics (E[x], E[x^2])."""
    mu = jnp.mean(h, axis=-1, keepdims=True)
    mu2 = jnp.mean(h * h, axis=-1, keepdims=True)
    var = jnp.maximum(mu2 - mu * mu, 0.0)
    return (h - mu) * lax.rsqrt(var + EPS) * gamma + beta


def residual_block_kernel(x_ref, w1_ref, b1_ref, g1_ref, be1_ref,
                          w2_ref, b2_ref, g2_ref, be2_ref, o_ref,
                          *, matmul_dtype, precision):
    x = x_ref[...].astype(jnp.float32)                       # (tm, H) f32 for LN/residual

    # Linear(H -> 2H): MXU operands in matmul_dtype, f32 accumulation.
    h = jnp.dot(x.astype(matmul_dtype), w1_ref[...],
                preferred_element_type=jnp.float32, precision=precision) + b1_ref[...]

    # LayerNorm(2H) in f32 (one-pass stats).
    h = _layernorm_onepass(h, g1_ref[...], be1_ref[...])

    # GELU (exact erf form — PyTorch default nn.GELU()), emitted directly in matmul_dtype.
    h = (0.5 * h * (1.0 + lax.erf(h * _INV_SQRT2))).astype(matmul_dtype)

    # Dropout(0.1): identity in eval mode.

    # Linear(2H -> H), f32 accumulation.
    h2 = jnp.dot(h, w2_ref[...],
                 preferred_element_type=jnp.float32, precision=precision) + b2_ref[...]

    # Residual + LayerNorm(H).
    o_ref[...] = _layernorm_onepass(x + h2, g2_ref[...], be2_ref[...]).astype(o_ref.dtype)


def _round_up(n, m):
    return (n + m - 1) // m * m


def _vmem_capacity_bytes():
    """Physical per-core VMEM; conservative fallback if the query is unavailable."""
    try:
        return int(pltpu.get_tpu_info().vmem_capacity_bytes)
    except Exception:
        return 64 * 2**20  # safe on every generation (v7x has 64 MiB / core)


def _choose_tm(n_rows, h, h2, weight_bytes, vmem_cap, prefer_two_steps):
    """Largest row tile (multiple of 8, 256-aligned candidates first) fitting the budget."""
    n8 = _round_up(max(n_rows, 1), 8)
    tm = 8
    for cand in (1024, 768, 512, 256, 128, 64, 32, 16, 8):
        if cand > n8:
            continue
        tile_bytes = 2 * 2 * cand * h * 4 + 4 * cand * h2 * 4   # x/out dbl-buf + f32 temps
        if weight_bytes + tile_bytes <= int(0.9 * vmem_cap):
            tm = cand
            break
    # Keep both TensorCores busy on dual-core chips (v7x): at least 2 grid steps.
    if prefer_two_steps and pl.cdiv(n_rows, tm) < 2 and n_rows > 8:
        tm = max(8, _round_up(pl.cdiv(n_rows, 2), 8))
    return tm


def residual_block(x, params, *, tm=None, matmul_dtype=jnp.bfloat16):
    """x: (batch, seq, hidden) float32.

    matmul_dtype=jnp.bfloat16 (default) for MXU speed with f32 accumulation;
    matmul_dtype=jnp.float32 for exact-parity checks (uses precision=HIGHEST).
    """
    B, S, H = x.shape
    N = B * S
    x2 = x.reshape(N, H)

    w1, b1, g1, be1, w2, b2, g2, be2 = params
    H2 = w1.shape[1]

    cap_phys = _vmem_capacity_bytes()
    vmem_cap = int(0.8 * cap_phys)              # headroom for compiler internal scratch
    two_core = cap_phys <= 80 * 2**20           # v7x-like: 64 MiB per core, 2 cores/chip

    bpe_w = jnp.dtype(matmul_dtype).itemsize
    weight_bytes = (H * H2 + H2 * H) * bpe_w + (3 * H2 + 3 * H) * 4

    if tm is None:
        tm = _choose_tm(N, H, H2, weight_bytes, vmem_cap, two_core)
    else:
        tm = max(8, min(_round_up(tm, 8), _round_up(N, 8)))

    grid = pl.cdiv(N, tm)                       # partial last tile -> masked writeback

    # Weights stored in matmul_dtype (halves VMEM/HBM when bf16); bias/LN params stay f32.
    w1c = w1.astype(matmul_dtype)
    w2c = w2.astype(matmul_dtype)

    precision = lax.Precision.HIGHEST if matmul_dtype == jnp.float32 else None

    # Grid-invariant operands: constant index_map + single buffer (no double-buffering).
    def resident(shape):
        return pl.BlockSpec(shape, lambda i: (0, 0), pipeline_mode=pl.Buffered(1))

    act_bytes = 2 * 2 * tm * H * 4              # x + out tiles, double-buffered, f32
    interm_bytes = 4 * tm * H2 * 4              # post-matmul / post-LN / GELU / cast temps
    needed = weight_bytes + act_bytes + interm_bytes + (2 << 20)
    vmem_limit = int(min(vmem_cap, max(needed, 16 << 20)))

    cost = pl.CostEstimate(
        flops=4 * N * H * H2,                   # two matmuls of (N,H)x(H,2H)
        transcendentals=N * H2,                 # erf in GELU
        bytes_accessed=2 * N * H * 4 + weight_bytes,
    )

    out = pl.pallas_call(
        functools.partial(residual_block_kernel,
                          matmul_dtype=matmul_dtype, precision=precision),
        out_shape=jax.ShapeDtypeStruct((N, H), x.dtype),
        grid_spec=pltpu.PrefetchScalarGridSpec(
            num_scalar_prefetch=0,
            grid=(grid,),
            in_specs=[
                pl.BlockSpec((tm, H), lambda i: (i, 0)),   # x rows (pipelined)
                resident((H, H2)),                         # W1
                resident((1, H2)),                         # b1
                resident((1, H2)),                         # ln1 gamma
                resident((1, H2)),                         # ln1 beta
                resident((H2, H)),                         # W2
                resident((1, H)),                          # b2
                resident((1, H)),                          # ln2 gamma
                resident((1, H)),                          # ln2 beta
            ],
            out_specs=pl.BlockSpec((tm, H), lambda i: (i, 0)),
        ),
        compiler_params=pltpu.CompilerParams(
            dimension_semantics=("parallel",),
            vmem_limit_bytes=vmem_limit,
        ),
        cost_estimate=cost,
    )(x2, w1c, b1, g1, be1, w2c, b2, g2, be2)

    return out.reshape(B, S, H)


def init_params(key, hidden_dim):
    """Deterministic init mimicking nn.Linear (uniform(±1/sqrt(fan_in))) and
    nn.LayerNorm (gamma=1, beta=0)."""
    h, h2 = hidden_dim, hidden_dim * 2
    k1, k2, k3, k4 = jax.random.split(key, 4)
    bnd1 = 1.0 / math.sqrt(h)
    bnd2 = 1.0 / math.sqrt(h2)
    w1 = jax.random.uniform(k1, (h, h2), jnp.float32, -bnd1, bnd1)
    b1 = jax.random.uniform(k2, (1, h2), jnp.float32, -bnd1, bnd1)
    w2 = jax.random.uniform(k3, (h2, h), jnp.float32, -bnd2, bnd2)
    b2 = jax.random.uniform(k4, (1, h), jnp.float32, -bnd2, bnd2)
    g1 = jnp.ones((1, h2), jnp.float32)
    be1 = jnp.zeros((1, h2), jnp.float32)
    g2 = jnp.ones((1, h), jnp.float32)
    be2 = jnp.zeros((1, h), jnp.float32)
    return (w1, b1, g1, be1, w2, b2, g2, be2)


def _layernorm_ref(h, gamma, beta):
    mu = jnp.mean(h, axis=-1, keepdims=True)
    var = jnp.mean((h - mu) ** 2, axis=-1, keepdims=True)
    return (h - mu) * lax.rsqrt(var + EPS) * gamma + beta


def residual_block_ref(x, params):
    """Pure-JAX f32 reference (matches the PyTorch module in eval mode)."""
    w1, b1, g1, be1, w2, b2, g2, be2 = params
    h = x @ w1 + b1
    h = _layernorm_ref(h, g1, be1)
    h = 0.5 * h * (1.0 + lax.erf(h * _INV_SQRT2))
    h2 = h @ w2 + b2
    return _layernorm_ref(x + h2, g2, be2)


if __name__ == "__main__":
    key = jax.random.PRNGKey(0)
    k_x, k_p, k_x2 = jax.random.split(key, 3)

    batch, seq, hidden = 2, 8, 32
    x = jax.random.normal(k_x, (batch, seq, hidden), jnp.float32)
    params = init_params(k_p, hidden)
    y_ref = residual_block_ref(x, params)

    # Exact-semantics path (f32 MXU operands, precision=HIGHEST): tight tolerance.
    y_f32 = jax.block_until_ready(residual_block(x, params, matmul_dtype=jnp.float32))
    assert y_f32.shape == (batch, seq, hidden)
    assert jnp.allclose(y_f32, y_ref, atol=2e-4, rtol=2e-4), "f32 path mismatch"

    # Performance path (default: bf16 MXU operands, f32 accumulation / LN / GELU / residual).
    y_bf16 = jax.block_until_ready(residual_block(x, params))
    assert y_bf16.shape == (batch, seq, hidden)
    assert jnp.allclose(y_bf16, y_ref, atol=5e-2, rtol=5e-2), "bf16 path mismatch"

    # Ragged row count (N not a multiple of the tile): exercises the padless
    # partial-tile / masked-writeback path.
    b2_, s2_ = 3, 7
    x_rag = jax.random.normal(k_x2, (b2_, s2_, hidden), jnp.float32)
    y_rag = jax.block_until_ready(residual_block(x_rag, params))
    y_rag_ref = residual_block_ref(x_rag, params)
    assert y_rag.shape == (b2_, s2_, hidden)
    assert jnp.allclose(y_rag, y_rag_ref, atol=5e-2, rtol=5e-2), "ragged path mismatch"

    print("KERNEL_OK")
</pallas_src>

<mosaic_0001>
module attributes {stable_mosaic.version = 11 : i64} {
  func.func @residual_block_kernel(%arg0: i32, %arg1: memref<8x32xf32, #tpu.memory_space<vmem>>, %arg2: memref<32x64xf32, #tpu.memory_space<vmem>>, %arg3: memref<1x64xf32, #tpu.memory_space<vmem>>, %arg4: memref<1x64xf32, #tpu.memory_space<vmem>>, %arg5: memref<1x64xf32, #tpu.memory_space<vmem>>, %arg6: memref<64x32xf32, #tpu.memory_space<vmem>>, %arg7: memref<1x32xf32, #tpu.memory_space<vmem>>, %arg8: memref<1x32xf32, #tpu.memory_space<vmem>>, %arg9: memref<1x32xf32, #tpu.memory_space<vmem>>, %arg10: memref<8x32xf32, #tpu.memory_space<vmem>>) attributes {dimension_semantics = [#tpu.dimension_semantics<parallel>], iteration_bounds = array<i64: 2>, scalar_prefetch = 0 : i64, scratch_operands = 0 : i64, tpu.core_type = #tpu.core_type<tc>, window_params = [{transform_indices = @transform_0, window_bounds = array<i64: 8, 32>}, {pipeline_mode = #tpu.pipeline_mode<synchronous>, transform_indices = @transform_1, window_bounds = array<i64: 32, 64>}, {pipeline_mode = #tpu.pipeline_mode<synchronous>, transform_indices = @transform_2, window_bounds = array<i64: 1, 64>}, {pipeline_mode = #tpu.pipeline_mode<synchronous>, transform_indices = @transform_3, window_bounds = array<i64: 1, 64>}, {pipeline_mode = #tpu.pipeline_mode<synchronous>, transform_indices = @transform_4, window_bounds = array<i64: 1, 64>}, {pipeline_mode = #tpu.pipeline_mode<synchronous>, transform_indices = @transform_5, window_bounds = array<i64: 64, 32>}, {pipeline_mode = #tpu.pipeline_mode<synchronous>, transform_indices = @transform_6, window_bounds = array<i64: 1, 32>}, {pipeline_mode = #tpu.pipeline_mode<synchronous>, transform_indices = @transform_7, window_bounds = array<i64: 1, 32>}, {pipeline_mode = #tpu.pipeline_mode<synchronous>, transform_indices = @transform_8, window_bounds = array<i64: 1, 32>}, {transform_indices = @transform_9, window_bounds = array<i64: 8, 32>}]} {
    %c0 = arith.constant 0 : index
    %c0_0 = arith.constant 0 : index
    %0 = vector.load %arg1[%c0, %c0_0] : memref<8x32xf32, #tpu.memory_space<vmem>>, vector<8x32xf32>
    %c0_1 = arith.constant 0 : index
    %c0_2 = arith.constant 0 : index
    %1 = vector.load %arg2[%c0_1, %c0_2] : memref<32x64xf32, #tpu.memory_space<vmem>>, vector<32x64xf32>
    %cst = arith.constant dense<0.000000e+00> : vector<8x64xf32>
    %2 = tpu.matmul %0, %1, %cst {dimension_numbers = #tpu.dot_dimension_numbers<[1], [0], [0], [1], [0, 0, 1, 1], [], []>, precision = #tpu.contract_precision<fp32>} : vector<8x32xf32>, vector<32x64xf32>, vector<8x64xf32> -> vector<8x64xf32>
    %c0_3 = arith.constant 0 : index
    %c0_4 = arith.constant 0 : index
    %3 = vector.load %arg3[%c0_3, %c0_4] : memref<1x64xf32, #tpu.memory_space<vmem>>, vector<1x64xf32>
    %4 = vector.broadcast %3 : vector<1x64xf32> to vector<8x64xf32>
    %5 = arith.addf %2, %4 : vector<8x64xf32>
    %c0_5 = arith.constant 0 : index
    %c0_6 = arith.constant 0 : index
    %6 = vector.load %arg4[%c0_5, %c0_6] : memref<1x64xf32, #tpu.memory_space<vmem>>, vector<1x64xf32>
    %c0_7 = arith.constant 0 : index
    %c0_8 = arith.constant 0 : index
    %7 = vector.load %arg5[%c0_7, %c0_8] : memref<1x64xf32, #tpu.memory_space<vmem>>, vector<1x64xf32>
    %cst_9 = arith.constant dense<0.000000e+00> : vector<8xf32>
    %8 = vector.multi_reduction <add>, %5, %cst_9 [1] : vector<8x64xf32> to vector<8xf32>
    %9 = vector.shape_cast %8 : vector<8xf32> to vector<8x1xf32>
    %cst_10 = arith.constant 6.400000e+01 : f32
    %10 = vector.broadcast %cst_10 : f32 to vector<8x1xf32>
    %11 = arith.divf %9, %10 : vector<8x1xf32>
    %12 = arith.mulf %5, %5 : vector<8x64xf32>
    %cst_11 = arith.constant dense<0.000000e+00> : vector<8xf32>
    %13 = vector.multi_reduction <add>, %12, %cst_11 [1] : vector<8x64xf32> to vector<8xf32>
    %14 = vector.shape_cast %13 : vector<8xf32> to vector<8x1xf32>
    %cst_12 = arith.constant 6.400000e+01 : f32
    %15 = vector.broadcast %cst_12 : f32 to vector<8x1xf32>
    %16 = arith.divf %14, %15 : vector<8x1xf32>
    %17 = arith.mulf %11, %11 : vector<8x1xf32>
    %18 = arith.subf %16, %17 : vector<8x1xf32>
    %cst_13 = arith.constant 0.000000e+00 : f32
    %19 = vector.broadcast %cst_13 : f32 to vector<8x1xf32>
    %20 = arith.maximumf %18, %19 : vector<8x1xf32>
    %21 = vector.broadcast %11 : vector<8x1xf32> to vector<8x64xf32>
    %22 = arith.subf %5, %21 : vector<8x64xf32>
    %cst_14 = arith.constant 9.99999974E-6 : f32
    %23 = vector.broadcast %cst_14 : f32 to vector<8x1xf32>
    %24 = arith.addf %20, %23 : vector<8x1xf32>
    %25 = math.rsqrt %24 : vector<8x1xf32>
    %26 = vector.broadcast %25 : vector<8x1xf32> to vector<8x64xf32>
    %27 = arith.mulf %22, %26 : vector<8x64xf32>
    %28 = vector.broadcast %6 : vector<1x64xf32> to vector<8x64xf32>
    %29 = arith.mulf %27, %28 : vector<8x64xf32>
    %30 = vector.broadcast %7 : vector<1x64xf32> to vector<8x64xf32>
    %31 = arith.addf %29, %30 : vector<8x64xf32>
    %cst_15 = arith.constant 5.000000e-01 : f32
    %32 = vector.broadcast %cst_15 : f32 to vector<8x64xf32>
    %33 = arith.mulf %32, %31 : vector<8x64xf32>
    %cst_16 = arith.constant 0.707106769 : f32
    %34 = vector.broadcast %cst_16 : f32 to vector<8x64xf32>
    %35 = arith.mulf %31, %34 : vector<8x64xf32>
    %36 = math.erf %35 : vector<8x64xf32>
    %cst_17 = arith.constant 1.000000e+00 : f32
    %37 = vector.broadcast %cst_17 : f32 to vector<8x64xf32>
    %38 = arith.addf %37, %36 : vector<8x64xf32>
    %39 = arith.mulf %33, %38 : vector<8x64xf32>
    %c0_18 = arith.constant 0 : index
    %c0_19 = arith.constant 0 : index
    %40 = vector.load %arg6[%c0_18, %c0_19] : memref<64x32xf32, #tpu.memory_space<vmem>>, vector<64x32xf32>
    %cst_20 = arith.constant dense<0.000000e+00> : vector<8x32xf32>
    %41 = tpu.matmul %39, %40, %cst_20 {dimension_numbers = #tpu.dot_dimension_numbers<[1], [0], [0], [1], [0, 0, 1, 1], [], []>, precision = #tpu.contract_precision<fp32>} : vector<8x64xf32>, vector<64x32xf32>, vector<8x32xf32> -> vector<8x32xf32>
    %c0_21 = arith.constant 0 : index
    %c0_22 = arith.constant 0 : index
    %42 = vector.load %arg7[%c0_21, %c0_22] : memref<1x32xf32, #tpu.memory_space<vmem>>, vector<1x32xf32>
    %43 = vector.broadcast %42 : vector<1x32xf32> to vector<8x32xf32>
    %44 = arith.addf %41, %43 : vector<8x32xf32>
    %45 = arith.addf %0, %44 : vector<8x32xf32>
    %c0_23 = arith.constant 0 : index
    %c0_24 = arith.constant 0 : index
    %46 = vector.load %arg8[%c0_23, %c0_24] : memref<1x32xf32, #tpu.memory_space<vmem>>, vector<1x32xf32>
    %c0_25 = arith.constant 0 : index
    %c0_26 = arith.constant 0 : index
    %47 = vector.load %arg9[%c0_25, %c0_26] : memref<1x32xf32, #tpu.memory_space<vmem>>, vector<1x32xf32>
    %cst_27 = arith.constant dense<0.000000e+00> : vector<8xf32>
    %48 = vector.multi_reduction <add>, %45, %cst_27 [1] : vector<8x32xf32> to vector<8xf32>
    %49 = vector.shape_cast %48 : vector<8xf32> to vector<8x1xf32>
    %cst_28 = arith.constant 3.200000e+01 : f32
    %50 = vector.broadcast %cst_28 : f32 to vector<8x1xf32>
    %51 = arith.divf %49, %50 : vector<8x1xf32>
    %52 = arith.mulf %45, %45 : vector<8x32xf32>
    %cst_29 = arith.constant dense<0.000000e+00> : vector<8xf32>
    %53 = vector.multi_reduction <add>, %52, %cst_29 [1] : vector<8x32xf32> to vector<8xf32>
    %54 = vector.shape_cast %53 : vector<8xf32> to vector<8x1xf32>
    %cst_30 = arith.constant 3.200000e+01 : f32
    %55 = vector.broadcast %cst_30 : f32 to vector<8x1xf32>
    %56 = arith.divf %54, %55 : vector<8x1xf32>
    %57 = arith.mulf %51, %51 : vector<8x1xf32>
    %58 = arith.subf %56, %57 : vector<8x1xf32>
    %cst_31 = arith.constant 0.000000e+00 : f32
    %59 = vector.broadcast %cst_31 : f32 to vector<8x1xf32>
    %60 = arith.maximumf %58, %59 : vector<8x1xf32>
    %61 = vector.broadcast %51 : vector<8x1xf32> to vector<8x32xf32>
    %62 = arith.subf %45, %61 : vector<8x32xf32>
    %cst_32 = arith.constant 9.99999974E-6 : f32
    %63 = vector.broadcast %cst_32 : f32 to vector<8x1xf32>
    %64 = arith.addf %60, %63 : vector<8x1xf32>
    %65 = math.rsqrt %64 : vector<8x1xf32>
    %66 = vector.broadcast %65 : vector<8x1xf32> to vector<8x32xf32>
    %67 = arith.mulf %62, %66 : vector<8x32xf32>
    %68 = vector.broadcast %46 : vector<1x32xf32> to vector<8x32xf32>
    %69 = arith.mulf %67, %68 : vector<8x32xf32>
    %70 = vector.broadcast %47 : vector<1x32xf32> to vector<8x32xf32>
    %71 = arith.addf %69, %70 : vector<8x32xf32>
    %c0_33 = arith.constant 0 : index
    %c0_34 = arith.constant 0 : index
    %72 = vector.load %arg10[%c0_33, %c0_34] : memref<8x32xf32, #tpu.memory_space<vmem>>, vector<8x32xf32>
    tpu.vector_store %arg10[%c0_33, %c0_34], %71 {strides = array<i32>} : memref<8x32xf32, #tpu.memory_space<vmem>>, vector<8x32xf32>,
    return
  }
  func.func @transform_0(%arg0: i32) -> (i32, i32) {
    %c0_i32 = arith.constant 0 : i32
    %c0_i32_0 = arith.constant 0 : i32
    return %arg0, %c0_i32 : i32, i32
  }
  func.func @transform_1(%arg0: i32) -> (i32, i32) {
    %c0_i32 = arith.constant 0 : i32
    %c0_i32_0 = arith.constant 0 : i32
    %c0_i32_1 = arith.constant 0 : i32
    return %c0_i32, %c0_i32_0 : i32, i32
  }
  func.func @transform_2(%arg0: i32) -> (i32, i32) {
    %c0_i32 = arith.constant 0 : i32
    %c0_i32_0 = arith.constant 0 : i32
    %c0_i32_1 = arith.constant 0 : i32
    return %c0_i32, %c0_i32_0 : i32, i32
  }
  func.func @transform_3(%arg0: i32) -> (i32, i32) {
    %c0_i32 = arith.constant 0 : i32
    %c0_i32_0 = arith.constant 0 : i32
    %c0_i32_1 = arith.constant 0 : i32
    return %c0_i32, %c0_i32_0 : i32, i32
  }
  func.func @transform_4(%arg0: i32) -> (i32, i32) {
    %c0_i32 = arith.constant 0 : i32
    %c0_i32_0 = arith.constant 0 : i32
    %c0_i32_1 = arith.constant 0 : i32
    return %c0_i32, %c0_i32_0 : i32, i32
  }
  func.func @transform_5(%arg0: i32) -> (i32, i32) {
    %c0_i32 = arith.constant 0 : i32
    %c0_i32_0 = arith.constant 0 : i32
    %c0_i32_1 = arith.constant 0 : i32
    return %c0_i32, %c0_i32_0 : i32, i32
  }
  func.func @transform_6(%arg0: i32) -> (i32, i32) {
    %c0_i32 = arith.constant 0 : i32
    %c0_i32_0 = arith.constant 0 : i32
    %c0_i32_1 = arith.constant 0 : i32
    return %c0_i32, %c0_i32_0 : i32, i32
  }
  func.func @transform_7(%arg0: i32) -> (i32, i32) {
    %c0_i32 = arith.constant 0 : i32
    %c0_i32_0 = arith.constant 0 : i32
    %c0_i32_1 = arith.constant 0 : i32
    return %c0_i32, %c0_i32_0 : i32, i32
  }
  func.func @transform_8(%arg0: i32) -> (i32, i32) {
    %c0_i32 = arith.constant 0 : i32
    %c0_i32_0 = arith.constant 0 : i32
    %c0_i32_1 = arith.constant 0 : i32
    return %c0_i32, %c0_i32_0 : i32, i32
  }
  func.func @transform_9(%arg0: i32) -> (i32, i32) {
    %c0_i32 = arith.constant 0 : i32
    %c0_i32_0 = arith.constant 0 : i32
    return %arg0, %c0_i32 : i32, i32
  }
}

</mosaic_0001>

<bundles_post_ra>
// kernel: tpu_custom_call.1
= control target key start
LH: loop header
LB: loop body
LE: loop exit
PB: predicated region body
PF: predicated region fallthrough
CT: control target
= control target key end

     0   :  { %14 = vsyncpa [#allocation3], 0  ;;  %s1428_s0 = inlined_call_operand.vmem [shape: f32[16,32], index: 0, kind: input, shape index: {}]   ;;  %s1429_s1 = inlined_call_operand.vmem [shape: f32[32,64], index: 1, kind: input, shape index: {}]   ;;  %s1430_s2 = inlined_call_operand.vmem [shape: f32[1,64], index: 2, kind: input, shape index: {}]   ;;  %s1431_s3 = inlined_call_operand.vmem [shape: f32[1,64], index: 3, kind: input, shape index: {}]   ;;  %s1432_s4 = inlined_call_operand.vmem [shape: f32[1,64], index: 4, kind: input, shape index: {}]   ;;  %s1433_s5 = inlined_call_operand.vmem [shape: f32[64,32], index: 5, kind: input, shape index: {}]   ;;  %s1434_s6 = inlined_call_operand.vmem [shape: f32[1,32], index: 6, kind: input, shape index: {}]   ;;  %s1435_s7 = inlined_call_operand.vmem [shape: f32[1,32], index: 7, kind: input, shape index: {}]   ;;  %s1436_s8 = inlined_call_operand.vmem [shape: f32[1,32], index: 8, kind: input, shape index: {}]   ;;  %s1437_s9 = inlined_call_operand.hbm [shape: f32[16,32], index: 9, kind: output, shape index: {}]  }
   0x1   :  { %16 = vsyncpa [#allocation3 + $0x1], 0  ;;  %s1168_s30 = smov 0   ;;  %s1170_s10 = smov 0  }
   0x2   :  { %s1172_s11 = smov 0   ;;  %s1174_s12 = smov 0  }
   0x3 LB: > { %s1189_s13 = sadd.s32 4294967295, %s1114_s12   ;;  %s984_s14 = sadd.s32 4294967294, %s1114_s12   ;;  %s1114_s12 = sphi %s1174_s12, %s1443_s12   ;;  %s1110_s11 = sphi %s1172_s11, %s1442_s11   ;;  %s1106_s10 = sphi %s1170_s10, %s1441_s10   ;;  %s1102_s30 = sphi %s1168_s30, %s1440_s30  }
   0x4   : > { %s1193_s15 = sadd.s32 1, %s1114_s12   ;;  %s223_s16 = sadd.s32 1, %s1110_s11 }
   0x5   : > { %s220_s17 = ssub.s32 %s1114_s12, %s1193_s15  ;;  %p233_p0 = scmp.ne.s32.totalorder %s1110_s11, %s1106_s10 }
   0x6   : > { %p221_p1 = scmp.eq.s32.totalorder %s220_s17, 0  ;;  %p234_p2 = scmp.eq.s32.totalorder %s1189_s13, 1 }
   0x7   : > { %p239_p3 = scmp.ne.s32.totalorder %s1106_s10, %s1102_s30  ;;  %p240_p4 = scmp.eq.s32.totalorder %s984_s14, 1 }
   0x8   : > { %s1204_s18 = scalar_select %p221_p1, %s1110_s11, %s223_s16  }
   0x9   : > { %p1206_p5 = por %p234_p2, %p233_p0  ;;  %p1210_p6 = por %p240_p4, %p239_p3 }
   0xa   : > { %p987_p7 = scmp.ge.s32.totalorder %s1114_s12, 1  ;;  %p289_p8 = scmp.lt.s32.totalorder %s1114_s12, 3 }
   0xc   : > { %p290_p9 = pnand %p987_p7, %p289_p8 }
   0xd   : > { %p324_p10 = scmp.lt.s32.totalorder (!%p290_p9), %s1189_s13, 1  ;;  %s321_s22 = sand.u32 (!%p290_p9), 1, %s1106_s10  }
   0xe   : > { %293 = sbr.rel (%p290_p9) target bundleno = 699 (0x2bb), region = 56  ;;  %s988_s23 = sshll.u32 (!%p290_p9), %s321_s22, 3 }
   0xf   : > { %s992_s24 = sshll.u32 (!%p290_p9), %s1189_s13, 3  ;;  %s910_s25 = scalar_lea.sflag (!%p290_p9), [#allocation3], %s321_s22 }
  0x13   : > { %v332_v0 = vld [vmem:[%s1429_s1 + $0x18] sm:$0xff]  ;;  %v331_v1 = vld [vmem:[%s1429_s1 + $0x10] sm:$0xff]  ;;  %v330_v2 = vld [vmem:[%s1429_s1 + $0x8] sm:$0xff]  ;;  %s325_s29 = scalar_select %p324_p10, %s1189_s13, 1  ;;  %vm337_vm0 = vcmask 261120   ;;  %vm528_vm1 = vcmask 523264  }
  0x14   : > { %v353_v3 = vand.u32 4294901760, %v332_v0  ;;  %v355_v4 = vand.u32 4294901760, %v331_v1  ;;  %v357_v5 = vand.u32 4294901760, %v330_v2  ;;  %v329_v6 = vld [vmem:[%s1429_s1] sm:$0xff]  ;;  %v1116_v47 = vmov 64.0   ;;  %v620_v56 = vld [vmem:[%s1433_s5 + $0x38] sm:$0xff] }
  0x15   : > { %v359_v7 = vand.u32 4294901760, %v329_v6  ;;  %s989_s14 = sshll.u32 %s325_s29, 3  ;;  %v1036_v31 = vld [vmem:[%s1430_s2] ss:$0 sm:$0xff]  ;;  %1042 = vrcp.f32 %v1116_v47  ;;  %v619_v57 = vld [vmem:[%s1433_s5 + $0x30] sm:$0xff]  ;;  %v618_v58 = vld [vmem:[%s1433_s5 + $0x28] sm:$0xff]  ;;  %s920_s29 = scalar_lea.hbm %s1437_s9, %s992_s24 }
  0x16   : > { %v383_v8 = vsub.f32 %v332_v0, %v353_v3  ;;  %354 = vmatpush.msra.mxu0 %v353_v3  ;;  %v389_v9 = vsub.f32 %v331_v1, %v355_v4  ;;  %454 = vmatpush.msra.mxu3 %v353_v3  ;;  %v395_v10 = vsub.f32 %v330_v2, %v357_v5  ;;  %s327_s21 = scalar_lea.vmem %s1428_s0, %s989_s14  ;;  %v1258_v59 = vand.u32 4294901760, %v620_v56  ;;  %v617_v62 = vld [vmem:[%s1433_s5 + $0x20] sm:$0xff]  ;;  %v616_v63 = vld [vmem:[%s1433_s5 + $0x18] sm:$0xff]  ;;  %v615_v0 = vld [vmem:[%s1433_s5 + $0x10] sm:$0xff]  ;;  %s323_s13 = scalar_lea.vmem [#allocation2], %s988_s23 }
  0x17   : > { %v401_v11 = vsub.f32 %v329_v6, %v359_v7  ;;  %v1233_v15 = vld [vmem:[%s327_s21] sm:$0xff]  ;;  %v1260_v60 = vand.u32 4294901760, %v619_v57  ;;  %v1262_v61 = vand.u32 4294901760, %v618_v58  ;;  %v1273_v1 = vand.u32 4294901760, %v617_v62  ;;  %s922_s17 = sshll.u32 %s323_s13, 4  ;;  %s924_s21 = sshll.u32 %s920_s29, 4  ;;  %s923_s17 = int_to_ptr.vmem [resolvable:$true] %s922_s17  ;;  %s925_s21 = int_to_ptr.hbm [resolvable:$true] %s924_s21 }
  0x18   : > { %425 = vmatpush.msra.mxu2 %v383_v8  ;;  %356 = vmatpush.msra.mxu0 %v355_v4  ;;  %v384_v12 = vand.u32 4294901760, %v383_v8  ;;  %v390_v13 = vand.u32 4294901760, %v389_v9  ;;  %v396_v14 = vand.u32 4294901760, %v395_v10  ;;  %v339_v19 = vsel %vm337_vm0, %v1233_v15, 0  ;;  %s1066_s26 = sshra.s32 %s925_s21, 4  ;;  %s1072_s23 = scalar_lea.hbm %s1437_s9, 16  ;;  %s1067_s26 = int_to_ptr.hbm [resolvable:$true] %s1066_s26 }
  0x19   : > { %456 = vmatpush.msra.mxu3 %v355_v4  ;;  %v402_v16 = vand.u32 4294901760, %v401_v11  ;;  %v361_v21 = vand.u32 4294901760, %v339_v19  ;;  %v1275_v2 = vand.u32 4294901760, %v616_v63  ;;  %v1283_v6 = vsub.f32 %v620_v56, %v1258_v59  ;;  %v1037_v56 = vld [vmem:[%s1431_s3] ss:$0 sm:$0xff]  ;;  %s1068_s24 = scalar_lea.hbm %s1067_s26, 8  ;;  %p1073_p0 = scmp.lt.s32.totalorder %s1067_s26, %s1437_s9 }
  0x1a   : > { %428 = vmatpush.msra.mxu2 %v389_v9  ;;  %v385_v17 = vsub.f32 %v383_v8, %v384_v12  ;;  %358 = vmatpush.msra.mxu0 %v357_v5  ;;  %v391_v18 = vsub.f32 %v389_v9, %v390_v13  ;;  %v397_v20 = vsub.f32 %v395_v10, %v396_v14  ;;  %p1069_p11 = scmp.ne.s32.totalorder %s1067_s26, %s1068_s24  ;;  %p1074_p1 = scmp.lt.s32.totalorder %s1072_s23, %s1068_s24 }
  0x1b   : > { %458 = vmatpush.msra.mxu3 %v357_v5  ;;  %v403_v24 = vsub.f32 %v401_v11, %v402_v16  ;;  %v362_v25 = vsub.f32 %v339_v19, %v361_v21  ;;  %v1043_v48 = vpop.eup %1042  ;;  %v1289_v8 = vsub.f32 %v618_v58, %v1262_v61 }
  0x1c   : > { %v386_v22 = vand.u32 4294901760, %v385_v17  ;;  %431 = vmatpush.msra.mxu2 %v395_v10  ;;  %v392_v23 = vand.u32 4294901760, %v391_v18  ;;  %360 = vmatpush.msra.mxu0 %v359_v7  ;;  %v398_v26 = vand.u32 4294901760, %v397_v20  ;;  %v533_v49 = vmul.f32 64.0, %v1043_v48  ;;  %p1070_p12 = pnand %p1069_p11, %p1206_p5  ;;  %p1075_p2 = por %p1074_p1, %p1073_p0 }
  0x1d   : > { %460 = vmatpush.msra.mxu3 %v359_v7  ;;  %v363_v27 = vand.u32 4294901760, %v362_v25  ;;  %v404_v28 = vand.u32 4294901760, %v403_v24  ;;  %vm537_vm2 = vweird.f32 %v1043_v48  ;;  %v683_v17 = vand.u32 4294901760, %v1289_v8 }
  0x1e   : > { %483 = vmatpush.msrb.mxu0 %v384_v12  ;;  %387 = vmatpush.msra.mxu1 %v386_v22  ;;  %v534_v50 = vsub.f32 1.0, %v533_v49  ;;  %v1298_v12 = vsub.f32 %v617_v62, %v1273_v1  ;;  %p1071_p13 = pneg %p1070_p12 }
  0x1f   : > { %434 = vmatpush.msra.mxu2 %v401_v11  ;;  %v364_v29 = vsub.f32 %v362_v25, %v363_v27  ;;  %464 = vmatmul.f32.vlgmr.msra.gmra.mxu3 %v363_v27  ;;  %v684_v24 = vsub.f32 %v1289_v8, %v683_v17  ;;  %v613_v27 = vld [vmem:[%s1433_s5] sm:$0xff] }
  0x20   : > { %437 = vmatmul.f32.vlgmr.msra.gmra.mxu2 %v362_v25  ;;  %487 = vmatpush.msrb.mxu0 %v390_v13  ;;  %v535_v51 = vmul.f32 %v1043_v48, %v534_v50  ;;  %v1301_v13 = vsub.f32 %v616_v63, %v1275_v2  ;;  %v689_v20 = vand.u32 4294901760, %v1298_v12  ;;  %p1076_p3 = pnand %p1075_p2, %p1071_p13 }
  0x21   : > { %393 = vmatpush.msra.mxu1 %v392_v23  ;;  %v365_v30 = vand.u32 4294901760, %v364_v29  ;;  %637 = vmatpush.msrb.mxu2 %v1258_v59 }
  0x22   : > { %491 = vmatpush.msrb.mxu0 %v396_v14  ;;  %v536_v52 = vadd.f32 %v1043_v48, %v535_v51  ;;  %v671_v14 = vand.u32 4294901760, %v1283_v6  ;;  %v695_v25 = vand.u32 4294901760, %v1301_v13 }
  0x23   : > { %399 = vmatpush.msra.mxu1 %v398_v26  ;;  %366 = vmatmul.f32.vlgmr.msra.gmra.mxu0 %v365_v30  ;;  %v690_v30 = vsub.f32 %v1298_v12, %v689_v20 }
  0x24   : > { %495 = vmatpush.msrb.mxu0 %v402_v16  ;;  %v538_v54 = vsel %vm537_vm2, %v1043_v48, %v536_v52  ;;  %639 = vmatpush.msrb.mxu2 %v1260_v60  ;;  %v672_v22 = vsub.f32 %v1283_v6, %v671_v14 }
  0x25   : > { %405 = vmatpush.msra.mxu1 %v404_v28 }
  0x26   : > { %407 = vmatmul.f32.vlgmr.msra.gmra.mxu1 %v361_v21  ;;  %732 = vmatpush.msra.mxu0 %v1283_v6  ;;  %v673_v28 = vand.u32 4294901760, %v672_v22 }
  0x27   : > { %514 = vmatpush.msrb.mxu1 %v353_v3  ;;  %v1277_v3 = vand.u32 4294901760, %v615_v0  ;;  %641 = vmatpush.msrb.mxu2 %v1262_v61 }
  0x28   : > { %674 = vmatpush.msrb.mxu3 %v673_v28 }
  0x29   : > { %516 = vmatpush.msrb.mxu1 %v355_v4  ;;  %v614_v4 = vld [vmem:[%s1433_s5 + $0x8] sm:$0xff]  ;;  %v1309_v18 = vsub.f32 %v615_v0, %v1277_v3  ;;  %643 = vmatpush.msrb.mxu2 %v1273_v1 }
  0x2a   : > { %v1293_v9 = vand.u32 4294901760, %v614_v4 }
  0x2b   : > { %518 = vmatpush.msrb.mxu1 %v357_v5  ;;  %497 = vmatmul.f32.vlgmr.msrb.gmra.mxu0 %v361_v21 }
  0x2c   : > { %645 = vmatpush.msrb.mxu2 %v1275_v2 }
  0x2d   : > { %520 = vmatpush.msrb.mxu1 %v359_v7  ;;  %v1286_v7 = vsub.f32 %v619_v57, %v1260_v60 }
  0x2e   : > { %522 = vmatmul.f32.vlgmr.msrb.gmra.mxu1 %v361_v21  ;;  %v1313_v21 = vsub.f32 %v614_v4, %v1293_v9  ;;  %647 = vmatpush.msrb.mxu2 %v1277_v3 }
  0x2f   : > { %769 = vmatpush.msra.mxu1 %v1258_v59  ;;  %v677_v16 = vand.u32 4294901760, %v1286_v7  ;;  %735 = vmatpush.msra.mxu0 %v1286_v7 }
  0x30   : > { %649 = vmatpush.msrb.mxu2 %v1293_v9 }
  0x31   : > { %771 = vmatpush.msra.mxu1 %v1260_v60  ;;  %v678_v23 = vsub.f32 %v1286_v7, %v677_v16  ;;  %738 = vmatpush.msra.mxu0 %v1289_v8 }
  0x33   : > { %773 = vmatpush.msra.mxu1 %v1262_v61  ;;  %v679_v29 = vand.u32 4294901760, %v678_v23  ;;  %741 = vmatpush.msra.mxu0 %v1298_v12 }
  0x35   : > { %775 = vmatpush.msra.mxu1 %v1273_v1  ;;  %680 = vmatpush.msrb.mxu3 %v679_v29 }
  0x36   : > { %744 = vmatpush.msra.mxu0 %v1301_v13 }
  0x37   : > { %777 = vmatpush.msra.mxu1 %v1275_v2 }
  0x38   : > { %747 = vmatpush.msra.mxu0 %v1309_v18 }
  0x39   : > { %779 = vmatpush.msra.mxu1 %v1277_v3 }
  0x3a   : > { %750 = vmatpush.msra.mxu0 %v1313_v21 }
  0x3b   : > { %781 = vmatpush.msra.mxu1 %v1293_v9 }
  0xa0   : > { %v367_v32 = vpop.f32.mrf.mxu0 }
  0xa1   : > { %v368_v34 = vadd.f32 %v1036_v31, %v367_v32  ;;  %v701_v31 = vand.u32 4294901760, %v1309_v18 }
  0xa2   : > { %v465_v37 = vpop.f32.mrf.mxu3 }
  0xa3   : > { %v408_v33 = vpop.f32.mrf.mxu1  ;;  %v438_v35 = vpop.f32.mrf.mxu2 }
  0xa4   : > { %v409_v36 = vadd.f32 %v408_v33, %v368_v34  ;;  %v685_v33 = vand.u32 4294901760, %v684_v24  ;;  %v696_v34 = vsub.f32 %v1301_v13, %v695_v25 }
  0xa6   : > { %v439_v38 = vadd.f32 %v438_v35, %v409_v36  ;;  %v707_v35 = vand.u32 4294901760, %v1313_v21  ;;  %v1341_v36 = vand.u32 4294901760, %v613_v27  ;;  %686 = vmatpush.msrb.mxu3 %v685_v33 }
  0xa8   : > { %v466_v39 = vadd.f32 %v465_v37, %v439_v38  ;;  %v498_v40 = vpop.f32.mrf.mxu0  ;;  %v691_v37 = vand.u32 4294901760, %v690_v30  ;;  %v702_v38 = vsub.f32 %v1309_v18, %v701_v31  ;;  %651 = vmatpush.msrb.mxu2 %v1341_v36  ;;  %783 = vmatpush.msra.mxu1 %v1341_v36 }
  0xaa   : > { %v499_v42 = vadd.f32 %v498_v40, %v466_v39  ;;  %v712_v39 = vsub.f32 %v613_v27, %v1341_v36  ;;  %v697_v40 = vand.u32 4294901760, %v696_v34  ;;  %692 = vmatpush.msrb.mxu3 %v691_v37  ;;  %802 = vmatpush.msra.mxu2 %v671_v14 }
  0xab   : > { %v523_v41 = vpop.f32.mrf.mxu1 }
  0xac   : > { %v1240_v43 = vadd.f32 %v523_v41, %v499_v42  ;;  %v708_v41 = vsub.f32 %v1313_v21, %v707_v35  ;;  %v713_v42 = vand.u32 4294901760, %v712_v39  ;;  %698 = vmatpush.msrb.mxu3 %v697_v40  ;;  %753 = vmatpush.msra.mxu0 %v712_v39 }
  0xad   : > { %806 = vmatpush.msra.mxu2 %v677_v16 }
  0xae   : > { %v529_v44 = vsel %vm528_vm1, %v1240_v43, 0.0  ;;  %v540_v45 = vmul.f32 %v1240_v43, %v1240_v43  ;;  %v709_v48 = vand.u32 4294901760, %v708_v41 }
  0xaf   : > { %530 = vadd.xlane.f32.xlu0 %v529_v44  ;;  %v703_v44 = vand.u32 4294901760, %v702_v38  ;;  %810 = vmatpush.msra.mxu2 %v683_v17 }
  0xb0   : > { %v541_v46 = vsel %vm528_vm1, %v540_v45, 0.0  ;;  %v714_v45 = vsub.f32 %v712_v39, %v713_v42 }
  0xb1   : > { %704 = vmatpush.msrb.mxu3 %v703_v44  ;;  %814 = vmatpush.msra.mxu2 %v689_v20 }
  0xb2   : > { %v715_v50 = vand.u32 4294901760, %v714_v45 }
  0xb3   : > { %710 = vmatpush.msrb.mxu3 %v709_v48  ;;  %818 = vmatpush.msra.mxu2 %v695_v25 }
  0xb5   : > { %716 = vmatpush.msrb.mxu3 %v715_v50  ;;  %822 = vmatpush.msra.mxu2 %v701_v31 }
  0xb7   : > { %542 = vadd.xlane.f32.xlu0 %v541_v46  ;;  %845 = vmatpush.msra.mxu3 %v1258_v59  ;;  %v1038_v59 = vld [vmem:[%s1432_s4] ss:$0 sm:$0xff] }
  0xb8   : > { %826 = vmatpush.msra.mxu2 %v707_v35 }
  0xb9   : > { %847 = vmatpush.msra.mxu3 %v1260_v60 }
  0xba   : > { %830 = vmatpush.msra.mxu2 %v713_v42  ;;  %v1039_v42 = vld [vmem:[%s1434_s6] ss:$0 sm:$0xff] }
  0xbb   : > { %849 = vmatpush.msra.mxu3 %v1262_v61 }
  0xbd   : > { %851 = vmatpush.msra.mxu3 %v1273_v1 }
  0xbf   : > { %853 = vmatpush.msra.mxu3 %v1275_v2 }
  0xc1   : > { %855 = vmatpush.msra.mxu3 %v1277_v3 }
  0xc3   : > { %857 = vmatpush.msra.mxu3 %v1293_v9 }
  0xc5   : > { %859 = vmatpush.msra.mxu3 %v1341_v36 }
 0x122   : > { %v531_v53 = vpop.xlane.xlu0 %530 }
 0x123   : > { %v1247_v55 = vmul.f32 %v538_v54, %v531_v53 }
 0x125   : > { %v545_v10 = vmul.f32 %v1247_v55, %v1247_v55 }
 0x12a   : > { %v543_v5 = vpop.xlane.xlu0 %542 }
 0x12b   : > { %v544_v11 = vmul.f32 %v543_v5, %v538_v54  ;;  %v548_v54 = vsub.f32 %v1240_v43, %v1247_v55 }
 0x12d   : > { %v546_v19 = vsub.f32 %v544_v11, %v545_v10 }
 0x12f   : > { %v547_v26 = vmax.f32 %v546_v19, 0.0 }
 0x131   : > { %v549_v32 = vadd.f32 1e-05, %v547_v26 }
 0x133   : > { %1044 = vrsqrt.f32 %v549_v32  ;;  %vm556_vm4 = vweird.f32 %v549_v32 }
 0x139   : > { %v1045_v46 = vpop.eup %1044 }
 0x13a   : > { %v551_v47 = vmul.f32 %v1045_v46, %v549_v32  ;;  %vm557_vm3 = vweird.f32 %v1045_v46 }
 0x13b   : > { %vm558_vm5 = vmor %vm556_vm4, %vm557_vm3 }
 0x13c   : > { %v552_v49 = vmul.f32 %v1045_v46, %v551_v47 }
 0x13e   : > { %v553_v51 = vmul.f32 0.5, %v552_v49 }
 0x140   : > { %v554_v52 = vsub.f32 1.5, %v553_v51 }
 0x142   : > { %v555_v53 = vmul.f32 %v1045_v46, %v554_v52 }
 0x144   : > { %v559_v57 = vsel %vm558_vm5, %v1045_v46, %v555_v53 }
 0x145   : > { %v560_v58 = vmul.f32 %v559_v57, %v548_v54 }
 0x147   : > { %v564_v43 = vmul.f32 %v1037_v56, %v560_v58 }
 0x149   : > { %v568_v55 = vadd.f32 %v1038_v59, %v564_v43 }
 0x14b   : > { %v570_v60 = vmul.f32 0.70710677, %v568_v55  ;;  %v569_v33 = vmul.f32 0.5, %v568_v55  ;;  %v1117_v55 = vmov 32.0  }
 0x14d   : > { %v571_v62 = vmul.f32 %v570_v60, %v570_v60 }
 0x14f   : > { %v572_v61 = vmin.f32 %v571_v62, 16.0 }
 0x151   : > { %v573_v63 = vmul.f32 2.1237322e-06, %v572_v61  ;;  %v584_v0 = vmul.f32 3.8918573e-05, %v572_v61 }
 0x153   : > { %v574_v4 = vadd.f32 0.00028619796, %v573_v63  ;;  %v585_v5 = vadd.f32 0.001143296, %v584_v0 }
 0x155   : > { %v575_v6 = vmul.f32 %v574_v4, %v572_v61  ;;  %v586_v1 = vmul.f32 %v585_v5, %v572_v61 }
 0x157   : > { %v587_v7 = vadd.f32 0.014752088, %v586_v1  ;;  %v576_v8 = vadd.f32 0.0036580483, %v575_v6 }
 0x159   : > { %v588_v10 = vmul.f32 %v587_v7, %v572_v61  ;;  %v577_v11 = vmul.f32 %v576_v8, %v572_v61 }
 0x15b   : > { %v589_v2 = vadd.f32 0.112945676, %v588_v10  ;;  %v578_v3 = vadd.f32 0.05243302, %v577_v11 }
 0x15d   : > { %v590_v12 = vmul.f32 %v589_v2, %v572_v61  ;;  %v579_v9 = vmul.f32 %v578_v3, %v572_v61 }
 0x15f   : > { %v591_v13 = vadd.f32 0.4994258, %v590_v12  ;;  %v580_v17 = vadd.f32 0.18741608, %v579_v9 }
 0x161   : > { %v592_v14 = vmul.f32 %v591_v13, %v572_v61  ;;  %v581_v19 = vmul.f32 %v580_v17, %v572_v61  ;;  %v1040_v17 = vld [vmem:[%s1435_s7] ss:$0 sm:$0xff] }
 0x163   : > { %v593_v16 = vadd.f32 1.0, %v592_v14  ;;  %v582_v23 = vadd.f32 1.1283791, %v581_v19 }
 0x165   : > { %1046 = vrcp.f32 %v593_v16  ;;  %v605_v22 = vand.u32 2147483648, %v593_v16  ;;  %v603_v25 = vand.u32 2147483647, %v593_v16  ;;  %vm599_vm7 = vweird.f32 %v593_v16 }
 0x166   : > { %v583_v28 = vmul.f32 %v582_v23, %v570_v60  ;;  %1048 = vrcp.f32 %v1117_v55 }
 0x167   : > { %v606_v27 = vor.u32 1.1754944e-38, %v605_v22  ;;  %vm604_vm9 = vcmp.eq.f32.partialorder %v603_v25, 8.507059e+37 }
 0x16b   : > { %v1047_v18 = vpop.eup %1046 }
 0x16c   : > { %v595_v20 = vmul.f32 %v1047_v18, %v593_v16  ;;  %vm600_vm6 = vweird.f32 %v1047_v18  ;;  %v1049_v60 = vpop.eup %1048 }
 0x16d   : > { %vm601_vm8 = vmor %vm599_vm7, %vm600_vm6  ;;  %v872_v62 = vmul.f32 32.0, %v1049_v60  ;;  %vm876_vm10 = vweird.f32 %v1049_v60 }
 0x16e   : > { %v596_v21 = vsub.f32 1.0, %v595_v20  ;;  %v1041_v20 = vld [vmem:[%s1436_s8] ss:$0 sm:$0xff] }
 0x16f   : > { %v873_v61 = vsub.f32 1.0, %v872_v62 }
 0x170   : > { %v597_v24 = vmul.f32 %v1047_v18, %v596_v21 }
 0x171   : > { %v874_v63 = vmul.f32 %v1049_v60, %v873_v61 }
 0x172   : > { %v598_v26 = vadd.f32 %v1047_v18, %v597_v24 }
 0x173   : > { %v875_v0 = vadd.f32 %v1049_v60, %v874_v63 }
 0x174   : > { %v602_v29 = vsel %vm601_vm8, %v1047_v18, %v598_v26 }
 0x175   : > { %v607_v30 = vsel %vm604_vm9, %v606_v27, %v602_v29  ;;  %v877_v5 = vsel %vm876_vm10, %v1049_v60, %v875_v0 }
 0x176   : > { %v608_v31 = vmul.f32 %v607_v30, %v583_v28 }
 0x178   : > { %v990_v32 = vclamps-f32 %v608_v31, 1.0 }
 0x17a   : > { %v611_v34 = vadd.f32 1.0, %v990_v32 }
 0x17c   : > { %v612_v35 = vmul.f32 %v611_v34, %v569_v33 }
 0x17e   : > { %v626_v36 = vsel %vm528_vm1, %v612_v35, 0 }
 0x17f   : > { %v652_v37 = vand.u32 4294901760, %v626_v36 }
 0x181   : > { %718 = vmatmul.f32.vlgmr.msrb.gmra.mxu3 %v652_v37  ;;  %v653_v38 = vsub.f32 %v626_v36, %v652_v37 }
 0x183   : > { %756 = vmatmul.f32.vlgmr.msra.gmra.mxu0 %v653_v38  ;;  %v654_v39 = vand.u32 4294901760, %v653_v38 }
 0x185   : > { %787 = vmatmul.f32.vlgmr.msra.gmra.mxu1 %v654_v39  ;;  %v655_v40 = vsub.f32 %v653_v38, %v654_v39 }
 0x187   : > { %v656_v41 = vand.u32 4294901760, %v655_v40 }
 0x189   : > { %657 = vmatmul.f32.vlgmr.msrb.gmra.mxu2 %v656_v41  ;;  %861 = vmatmul.f32.vlgmr.msra.gmra.mxu3 %v652_v37 }
 0x191   : > { %832 = vmatmul.f32.vlgmr.msra.gmra.mxu2 %v652_v37 }
 0x200   : > { %v757_v48 = vpop.f32.mrf.mxu0 }
 0x202   : > { %v788_v50 = vpop.f32.mrf.mxu1 }
 0x204   : > { %v719_v44 = vpop.f32.mrf.mxu3 }
 0x20c   : > { %v658_v45 = vpop.f32.mrf.mxu2  ;;  %v862_v54 = vpop.f32.mrf.mxu3 }
 0x20d   : > { %v659_v46 = vadd.f32 %v1039_v42, %v658_v45 }
 0x20f   : > { %v720_v47 = vadd.f32 %v719_v44, %v659_v46 }
 0x211   : > { %v758_v49 = vadd.f32 %v757_v48, %v720_v47 }
 0x213   : > { %v789_v51 = vadd.f32 %v788_v50, %v758_v49 }
 0x214   : > { %v833_v52 = vpop.f32.mrf.mxu2 }
 0x215   : > { %v834_v53 = vadd.f32 %v833_v52, %v789_v51 }
 0x217   : > { %v863_v56 = vadd.f32 %v862_v54, %v834_v53 }
 0x219   : > { %v865_v57 = vadd.f32 %v863_v56, %v1233_v15 }
 0x21b   : > { %v868_v58 = vsel %vm337_vm0, %v865_v57, 0.0  ;;  %v879_v59 = vmul.f32 %v865_v57, %v865_v57 }
 0x21c   : > { %869 = vadd.xlane.f32.xlu1 %v868_v58 }
 0x21d   : > { %v880_v43 = vsel %vm337_vm0, %v879_v59, 0.0 }
 0x224   : > { %881 = vadd.xlane.f32.xlu1 %v880_v43 }
 0x28f   : > { %v870_v4 = vpop.xlane.xlu1 %869 }
 0x290   : > { %v878_v6 = vmul.f32 %v877_v5, %v870_v4 }
 0x292   : > { %v884_v1 = vmul.f32 %v878_v6, %v878_v6  ;;  %v887_v9 = vsub.f32 %v865_v57, %v878_v6 }
 0x297   : > { %v882_v15 = vpop.xlane.xlu1 %881 }
 0x298   : > { %v883_v7 = vmul.f32 %v882_v15, %v877_v5 }
 0x29a   : > { %v885_v8 = vsub.f32 %v883_v7, %v884_v1 }
 0x29c   : > { %v886_v10 = vmax.f32 %v885_v8, 0.0 }
 0x29e   : > { %v888_v2 = vadd.f32 1e-05, %v886_v10 }
 0x2a0   : > { %1050 = vrsqrt.f32 %v888_v2  ;;  %vm895_vm12 = vweird.f32 %v888_v2 }
 0x2a6   : > { %v1051_v11 = vpop.eup %1050 }
 0x2a7   : > { %v890_v12 = vmul.f32 %v1051_v11, %v888_v2  ;;  %vm896_vm11 = vweird.f32 %v1051_v11 }
 0x2a8   : > { %vm897_vm13 = vmor %vm895_vm12, %vm896_vm11 }
 0x2a9   : > { %v891_v13 = vmul.f32 %v1051_v11, %v890_v12 }
 0x2ab   : > { %v892_v3 = vmul.f32 0.5, %v891_v13 }
 0x2ad   : > { %v893_v14 = vsub.f32 1.5, %v892_v3 }
 0x2af   : > { %v894_v16 = vmul.f32 %v1051_v11, %v893_v14 }
 0x2b1   : > { %v898_v18 = vsel %vm897_vm13, %v1051_v11, %v894_v16 }
 0x2b2   : > { %v899_v19 = vmul.f32 %v898_v18, %v887_v9 }
 0x2b4   : > { %v903_v21 = vmul.f32 %v1040_v17, %v899_v19 }
 0x2b6   : > { %v907_v22 = vadd.f32 %v1041_v20, %v903_v21 }
 0x2b8   : > { %908 = vst.msk [vmem:[%s323_s13] sm:$0xff] %vm337_vm0, %v907_v22 }
 0x2b9   : > { %1079 = shalt.err (!%p1076_p3)
}
 0x2ba   : > { %995 = dma.vmem_to_hbm [thread:$0]  (%p1206_p5), %s923_s17, 128, %s925_s21, %s910_s25  }
 0x2bb PF: > { %p1001_p4 = scmp.ge.s32.totalorder %s1114_s12, 2  ;;  %s936_s22 = sand.u32 1, %s1102_s30  }
 0x2bc   : > { %s937_s16 = scalar_lea.sflag [#allocation3], %s936_s22 }
 0x2bd   : > { %p998_p7 = pnand %p1001_p4, %p1210_p6 }
 0x2bf   : > { %p999_p8 = pneg %p998_p7 }
 0x2c1   : > { %1097 = dma.done.wait (%p999_p8), %s937_s16, 128  }
 0x2c2   : > { %1099 = vsyncadd (%p999_p8), %s937_s16, 4294967168  ;;  %p19_p9 = scmp.ge.s32.totalorder %s1193_s15, 4   ;;  %s1440_s30 = smov %s1106_s10 }
 0x2c3   : > { %s1441_s10 = smov %s1110_s11  ;;  %s1442_s11 = smov %s1204_s18 }
 0x2c4   : > { %s1443_s12 = smov %s1193_s15  ;;  %21 = sbr.rel (!%p19_p9) target bundleno = 3 (0x3), region = 91 }
 0x2c9   :  { %943 = vsyncpa [#allocation3], 1 }
 0x2ca   :  { %945 = vsyncpa [#allocation3 + $0x1], 1 }

</bundles_post_ra>
